<compile_context>
chip_gen: v5e
topology: v5e:2x2
jax: 0.10.0
libtpu: 0.0.40
codegen_flags: <defaults>
</compile_context>

<pallas_src>
import functools
import math
from dataclasses import dataclass
from typing import Optional

import jax
import jax.numpy as jnp
from jax.experimental import pallas as pl
from jax.experimental.pallas import tpu as pltpu


@dataclass
class ModelArgs:
    dim: int = 4096
    multiple_of: int = 256
    ffn_dim_multiplier: Optional[float] = None
    # (other fields from the reference dataclass are unused by FeedForward)


def ffn_hidden_dim(args: ModelArgs) -> int:
    hidden_dim = 4 * args.dim
    hidden_dim = int(2 * hidden_dim / 3)
    if args.ffn_dim_multiplier is not None:
        hidden_dim = int(args.ffn_dim_multiplier * hidden_dim)
    hidden_dim = args.multiple_of * (
        (hidden_dim + args.multiple_of - 1) // args.multiple_of
    )
    return hidden_dim


def _round_up(x: int, m: int) -> int:
    return (x + m - 1) // m * m


def _vmem_capacity_bytes() -> int:
    """Physical VMEM per TensorCore; conservative fallback if unqueryable."""
    try:
        info = pltpu.get_tpu_info()
        cap = getattr(info, "vmem_capacity_bytes", None)
        if cap:
            return int(cap)
    except Exception:
        pass
    return 64 * 1024 * 1024  # v7x per-TC size; safe lower bound for all gens


_TM_CANDIDATES = (1024, 768, 512, 384, 256, 128)
_TH_CANDIDATES = (1024, 512, 256, 128)


def _select_tiles(T, D, H, bytes_in, bytes_w, bytes_out, tm, th, budget):
    """Pick (tm, th) so the live VMEM footprint fits the budget.

    Footprint = double-buffered x + weight-chunk tiles, single-buffered out
    tile, f32 accumulator scratch, plus the in-kernel intermediates.
    """
    sub = 8 if bytes_in >= 4 else 16            # sublane multiple for token dim
    t_cap = max(sub, _round_up(T, sub))

    def vmem_need(tm_, th_):
        wts = 2 * 3 * D * th_ * bytes_w         # w1/w3/w2 chunks, double-buffered
        xin = 2 * tm_ * D * bytes_in            # x tile, double-buffered
        out = 1 * tm_ * D * bytes_out           # out tile, pl.Buffered(1)
        acc = tm_ * D * 4                       # f32 accumulator scratch
        inter = tm_ * th_ * (3 * 4 + bytes_w)   # g, v, silu*v (f32) + downcast
        return wts + xin + out + acc + inter

    auto_tm = tm is None
    if auto_tm:
        tm_cands = sorted({min(c, t_cap) for c in _TM_CANDIDATES}, reverse=True)
    else:
        tm_cands = [min(_round_up(tm, sub), t_cap)]

    if th is None:
        th_cands = [c for c in _TH_CANDIDATES if c <= H and H % c == 0]
        if not th_cands:
            th_cands = [128]
    else:
        th_cands = [th]

    def search(th_floor):
        for tm_ in tm_cands:                    # largest token tile first
            for th_ in th_cands:                # then largest hidden chunk
                if th_ < th_floor:
                    continue
                if vmem_need(tm_, th_) <= budget:
                    return tm_, th_
        return None

    # Keep the 2nd matmul's contraction depth >= 256 (fills the v6e/v7x
    # 256x256 MXU); prefer shrinking tm before letting th drop to 128.
    picked = search(256) or search(0)
    if picked is None:
        picked = (tm_cands[-1], th_cands[-1])   # over budget; use smallest tiles
    tm, th = picked

    # If the whole token range fits one tile but is reasonably large, split it
    # in two so both v7x TensorCores get a "parallel" grid step (harmless on
    # the single-core generations).
    if auto_tm and tm >= t_cap and t_cap >= 512:
        tm = _round_up(t_cap // 2, sub)

    return tm, th, vmem_need(tm, th)


def _ffn_kernel(x_ref, w1_ref, w3_ref, w2_ref, o_ref, acc_ref, *, precision):
    """One (token-tile, hidden-chunk) step.

    grid = (num_token_tiles, num_hidden_chunks). The hidden axis is the
    reduction axis of the second matmul, so the output tile is resident
    across it and accumulated in f32 scratch (init/finalize via pl.when).
    """
    h = pl.program_id(1)

    @pl.when(h == 0)
    def _():
        acc_ref[...] = jnp.zeros_like(acc_ref)

    x = x_ref[...]                                                  # (tm, D)
    g = jnp.dot(x, w1_ref[...], preferred_element_type=jnp.float32,
                precision=precision)                                # (tm, th)
    v = jnp.dot(x, w3_ref[...], preferred_element_type=jnp.float32,
                precision=precision)                                # (tm, th)
    hmid = g * jax.nn.sigmoid(g) * v                                # f32
    # Downcast to the weight dtype for the second MXU matmul (bf16 on the
    # default fast path -- intentional; accumulation stays f32).
    acc_ref[...] += jnp.dot(hmid.astype(w2_ref.dtype), w2_ref[...],
                            preferred_element_type=jnp.float32,
                            precision=precision)

    @pl.when(h == pl.num_programs(1) - 1)
    def _():
        o_ref[...] = acc_ref[...].astype(o_ref.dtype)


def feed_forward(x, w1, w3, w2, *, tm=None, th=None,
                 compute_dtype=jnp.bfloat16, vmem_budget_bytes=None):
    """x: (batch, seq, dim); w1/w3: (dim, hidden); w2: (hidden, dim).

    compute_dtype: operand dtype for the MXU (default bf16: full-rate MXU on
    v5e/v6e/v7x, f32 accumulation). Pass jnp.float32 only for validation --
    that path uses Precision.HIGHEST. Output keeps the input dtype.
    """
    B, S, D = x.shape
    H = w1.shape[1]
    assert w1.shape == (D, H) and w3.shape == (D, H) and w2.shape == (H, D)
    assert D % 128 == 0 and H % 128 == 0, "dim/hidden must be multiples of 128"

    out_dtype = x.dtype
    if compute_dtype is not None:
        # NOTE: in a real model, store the weights in compute_dtype at load
        # time so this cast (full weight HBM traffic) is not paid per call.
        x = x.astype(compute_dtype)
        w1 = w1.astype(compute_dtype)
        w3 = w3.astype(compute_dtype)
        w2 = w2.astype(compute_dtype)

    precision = (jax.lax.Precision.HIGHEST
                 if x.dtype == jnp.float32 else None)

    T = B * S
    x2d = x.reshape(T, D)

    if vmem_budget_bytes is None:
        vmem_budget_bytes = int(0.75 * _vmem_capacity_bytes())

    tm, th, need = _select_tiles(
        T, D, H, x2d.dtype.itemsize, w1.dtype.itemsize,
        jnp.dtype(out_dtype).itemsize, tm, th, vmem_budget_bytes)
    assert H % th == 0 and th % 128 == 0, (H, th)
    nH = H // th

    # Pad tokens to a multiple of tm (padded rows compute zeros, sliced off).
    T_pad = _round_up(T, tm)
    if T_pad != T:
        # TODO(synk): mask the ragged last token tile in-kernel instead of
        # materializing a padded copy of x (matters for long prefill).
        x2d = jnp.pad(x2d, ((0, T_pad - T), (0, 0)))

    grid = (T_pad // tm, nH)
    vmem_limit = min(_vmem_capacity_bytes(), int(need) + 8 * 1024 * 1024)

    out2d = pl.pallas_call(
        functools.partial(_ffn_kernel, precision=precision),
        out_shape=jax.ShapeDtypeStruct((T_pad, D), out_dtype),
        grid_spec=pltpu.PrefetchScalarGridSpec(
            num_scalar_prefetch=0,
            grid=grid,
            in_specs=[
                pl.BlockSpec((tm, D), lambda i, h: (i, 0)),   # x token tile
                pl.BlockSpec((D, th), lambda i, h: (0, h)),   # w1 hidden chunk
                pl.BlockSpec((D, th), lambda i, h: (0, h)),   # w3 hidden chunk
                pl.BlockSpec((th, D), lambda i, h: (h, 0)),   # w2 hidden chunk
            ],
            # Out tile is written once per hidden sweep -> single buffer
            # suffices; frees tm*D*bytes of VMEM for bigger tiles.
            out_specs=pl.BlockSpec((tm, D), lambda i, h: (i, 0),
                                   pipeline_mode=pl.Buffered(1)),
            scratch_shapes=[pltpu.VMEM((tm, D), jnp.float32)],
        ),
        compiler_params=pltpu.CompilerParams(
            dimension_semantics=("parallel", "arbitrary"),
            vmem_limit_bytes=int(vmem_limit),
        ),
    )(x2d, w1, w3, w2)

    if T_pad != T:
        out2d = out2d[:T]
    return out2d.reshape(B, S, D)


def reference_ffn(x2d, w1, w3, w2):
    hp = jax.lax.Precision.HIGHEST
    xf = x2d.astype(jnp.float32)
    g = jnp.dot(xf, w1.astype(jnp.float32), precision=hp)
    v = jnp.dot(xf, w3.astype(jnp.float32), precision=hp)
    h = g * jax.nn.sigmoid(g) * v
    return jnp.dot(h, w2.astype(jnp.float32), precision=hp)


if __name__ == "__main__":
    args = ModelArgs(dim=128, multiple_of=256, ffn_dim_multiplier=None)
    D = args.dim
    H = ffn_hidden_dim(args)  # = 512 for dim=128, multiple_of=256
    B, S = 2, 8

    key = jax.random.PRNGKey(0)
    kx, k1, k2, k3 = jax.random.split(key, 4)

    # Deterministic parameter init (Kaiming-uniform-like bound, as nn.Linear),
    # stored pre-transposed as (in, out) == nn.Linear weight.T.
    bound1 = 1.0 / math.sqrt(D)
    bound2 = 1.0 / math.sqrt(H)
    x = jax.random.normal(kx, (B, S, D), dtype=jnp.float32)
    w1 = jax.random.uniform(k1, (D, H), jnp.float32, -bound1, bound1)
    w3 = jax.random.uniform(k3, (D, H), jnp.float32, -bound1, bound1)
    w2 = jax.random.uniform(k2, (H, D), jnp.float32, -bound2, bound2)

    ref = reference_ffn(x.reshape(-1, D), w1, w3, w2).reshape(B, S, D)
    scale = float(jnp.max(jnp.abs(ref))) + 1e-6

    # Default bf16 fast path (bf16 operands, f32 MXU accumulation).
    out_bf16 = jax.block_until_ready(feed_forward(x, w1, w3, w2))
    assert out_bf16.shape == (B, S, D) and out_bf16.dtype == x.dtype
    err_bf16 = float(jnp.max(jnp.abs(out_bf16 - ref)))
    assert err_bf16 / scale < 5e-2, (err_bf16, scale)

    # f32 validation path (HIGHEST-precision MXU passes).
    out_f32 = jax.block_until_ready(
        feed_forward(x, w1, w3, w2, compute_dtype=jnp.float32))
    err_f32 = float(jnp.max(jnp.abs(out_f32 - ref)))
    assert err_f32 / scale < 1e-3, (err_f32, scale)

    print("KERNEL_OK")
</pallas_src>

<mosaic_0001>
module attributes {stable_mosaic.version = 11 : i64} {
  func.func @_ffn_kernel(%arg0: i32, %arg1: i32, %arg2: memref<16x128xbf16, #tpu.memory_space<vmem>>, %arg3: memref<128x512xbf16, #tpu.memory_space<vmem>>, %arg4: memref<128x512xbf16, #tpu.memory_space<vmem>>, %arg5: memref<512x128xbf16, #tpu.memory_space<vmem>>, %arg6: memref<16x128xf32, #tpu.memory_space<vmem>>, %arg7: memref<16x128xf32, #tpu.memory_space<vmem>>) attributes {dimension_semantics = [#tpu.dimension_semantics<parallel>, #tpu.dimension_semantics<arbitrary>], iteration_bounds = array<i64: 1, 1>, scalar_prefetch = 0 : i64, scratch_operands = 1 : i64, tpu.core_type = #tpu.core_type<tc>, window_params = [{transform_indices = @transform_0, window_bounds = array<i64: 16, 128>}, {transform_indices = @transform_1, window_bounds = array<i64: 128, 512>}, {transform_indices = @transform_2, window_bounds = array<i64: 128, 512>}, {transform_indices = @transform_3, window_bounds = array<i64: 512, 128>}, {pipeline_mode = #tpu.pipeline_mode<synchronous>, transform_indices = @transform_4, window_bounds = array<i64: 16, 128>}]} {
    %c0_i32 = arith.constant 0 : i32
    %0 = arith.cmpi eq, %arg1, %c0_i32 : i32
    %1 = arith.extui %0 : i1 to i32
    %c0_i32_0 = arith.constant 0 : i32
    %2 = arith.cmpi ne, %1, %c0_i32_0 : i32
    scf.if %2 {
      %cst_17 = arith.constant 0.000000e+00 : f32
      %24 = vector.broadcast %cst_17 : f32 to vector<16x128xf32>
      %c0_18 = arith.constant 0 : index
      %c0_19 = arith.constant 0 : index
      %25 = vector.load %arg7[%c0_18, %c0_19] : memref<16x128xf32, #tpu.memory_space<vmem>>, vector<16x128xf32>
      tpu.vector_store %arg7[%c0_18, %c0_19], %24 {strides = array<i32>} : memref<16x128xf32, #tpu.memory_space<vmem>>, vector<16x128xf32>,
    } else {
    }
    %c0 = arith.constant 0 : index
    %c0_1 = arith.constant 0 : index
    %3 = vector.load %arg2[%c0, %c0_1] : memref<16x128xbf16, #tpu.memory_space<vmem>>, vector<16x128xbf16>
    %c0_2 = arith.constant 0 : index
    %c0_3 = arith.constant 0 : index
    %4 = vector.load %arg3[%c0_2, %c0_3] : memref<128x512xbf16, #tpu.memory_space<vmem>>, vector<128x512xbf16>
    %cst = arith.constant dense<0.000000e+00> : vector<16x512xf32>
    %5 = tpu.matmul %3, %4, %cst {dimension_numbers = #tpu.dot_dimension_numbers<[1], [0], [0], [1], [0, 0, 1, 1], [], []>} : vector<16x128xbf16>, vector<128x512xbf16>, vector<16x512xf32> -> vector<16x512xf32>
    %c0_4 = arith.constant 0 : index
    %c0_5 = arith.constant 0 : index
    %6 = vector.load %arg4[%c0_4, %c0_5] : memref<128x512xbf16, #tpu.memory_space<vmem>>, vector<128x512xbf16>
    %cst_6 = arith.constant dense<0.000000e+00> : vector<16x512xf32>
    %7 = tpu.matmul %3, %6, %cst_6 {dimension_numbers = #tpu.dot_dimension_numbers<[1], [0], [0], [1], [0, 0, 1, 1], [], []>} : vector<16x128xbf16>, vector<128x512xbf16>, vector<16x512xf32> -> vector<16x512xf32>
    %8 = arith.negf %5 : vector<16x512xf32>
    %9 = math.exp %8 : vector<16x512xf32>
    %cst_7 = arith.constant 1.000000e+00 : f32
    %10 = vector.broadcast %cst_7 : f32 to vector<16x512xf32>
    %11 = arith.addf %10, %9 : vector<16x512xf32>
    %12 = arith.divf %10, %11 : vector<16x512xf32>
    %13 = arith.mulf %5, %12 : vector<16x512xf32>
    %14 = arith.mulf %13, %7 : vector<16x512xf32>
    %c0_8 = arith.constant 0 : index
    %c0_9 = arith.constant 0 : index
    %15 = vector.load %arg7[%c0_8, %c0_9] : memref<16x128xf32, #tpu.memory_space<vmem>>, vector<16x128xf32>
    %16 = arith.truncf %14 : vector<16x512xf32> to vector<16x512xbf16>
    %c0_10 = arith.constant 0 : index
    %c0_11 = arith.constant 0 : index
    %17 = vector.load %arg5[%c0_10, %c0_11] : memref<512x128xbf16, #tpu.memory_space<vmem>>, vector<512x128xbf16>
    %cst_12 = arith.constant dense<0.000000e+00> : vector<16x128xf32>
    %18 = tpu.matmul %16, %17, %cst_12 {dimension_numbers = #tpu.dot_dimension_numbers<[1], [0], [0], [1], [0, 0, 1, 1], [], []>} : vector<16x512xbf16>, vector<512x128xbf16>, vector<16x128xf32> -> vector<16x128xf32>
    %19 = arith.addf %15, %18 : vector<16x128xf32>
    %c0_13 = arith.constant 0 : index
    %c0_14 = arith.constant 0 : index
    %20 = vector.load %arg7[%c0_13, %c0_14] : memref<16x128xf32, #tpu.memory_space<vmem>>, vector<16x128xf32>
    tpu.vector_store %arg7[%c0_13, %c0_14], %19 {strides = array<i32>} : memref<16x128xf32, #tpu.memory_space<vmem>>, vector<16x128xf32>,
    %c0_i32_15 = arith.constant 0 : i32
    %21 = arith.cmpi eq, %arg1, %c0_i32_15 : i32
    %22 = arith.extui %21 : i1 to i32
    %c0_i32_16 = arith.constant 0 : i32
    %23 = arith.cmpi ne, %22, %c0_i32_16 : i32
    scf.if %23 {
      %c0_17 = arith.constant 0 : index
      %c0_18 = arith.constant 0 : index
      %24 = vector.load %arg7[%c0_17, %c0_18] : memref<16x128xf32, #tpu.memory_space<vmem>>, vector<16x128xf32>
      %c0_19 = arith.constant 0 : index
      %c0_20 = arith.constant 0 : index
      %25 = vector.load %arg6[%c0_19, %c0_20] : memref<16x128xf32, #tpu.memory_space<vmem>>, vector<16x128xf32>
      tpu.vector_store %arg6[%c0_19, %c0_20], %24 {strides = array<i32>} : memref<16x128xf32, #tpu.memory_space<vmem>>, vector<16x128xf32>,
    } else {
    }
    return
  }
  func.func @transform_0(%arg0: i32, %arg1: i32) -> (i32, i32) {
    %c0_i32 = arith.constant 0 : i32
    %c0_i32_0 = arith.constant 0 : i32
    return %arg0, %c0_i32 : i32, i32
  }
  func.func @transform_1(%arg0: i32, %arg1: i32) -> (i32, i32) {
    %c0_i32 = arith.constant 0 : i32
    %c0_i32_0 = arith.constant 0 : i32
    return %c0_i32, %arg1 : i32, i32
  }
  func.func @transform_2(%arg0: i32, %arg1: i32) -> (i32, i32) {
    %c0_i32 = arith.constant 0 : i32
    %c0_i32_0 = arith.constant 0 : i32
    return %c0_i32, %arg1 : i32, i32
  }
  func.func @transform_3(%arg0: i32, %arg1: i32) -> (i32, i32) {
    %c0_i32 = arith.constant 0 : i32
    %c0_i32_0 = arith.constant 0 : i32
    return %arg1, %c0_i32 : i32, i32
  }
  func.func @transform_4(%arg0: i32, %arg1: i32) -> (i32, i32) {
    %c0_i32 = arith.constant 0 : i32
    %c0_i32_0 = arith.constant 0 : i32
    return %arg0, %c0_i32 : i32, i32
  }
}

</mosaic_0001>

<bundles_post_ra>
// kernel: tpu_custom_call.1
= control target key start
LH: loop header
LB: loop body
LE: loop exit
PB: predicated region body
PF: predicated region fallthrough
CT: control target
= control target key end

     0   :  { %9 = vsyncpa [#allocation4], 0  ;;  %s2024_s0 = inlined_call_operand.hbm [shape: bf16[16,128], index: 0, kind: input, shape index: {}]   ;;  %s2025_s1 = inlined_call_operand.hbm [shape: bf16[128,512], index: 1, kind: input, shape index: {}]   ;;  %s2026_s2 = inlined_call_operand.hbm [shape: bf16[128,512], index: 2, kind: input, shape index: {}]   ;;  %s2027_s3 = inlined_call_operand.hbm [shape: bf16[512,128], index: 3, kind: input, shape index: {}]   ;;  %s2028_s4 = inlined_call_operand.hbm [shape: f32[16,128], index: 4, kind: output, shape index: {}]  }
   0x1   :  { %10 = vsyncpa [#allocation7], 0 }
   0x2   :  { %11 = vsyncpa [#allocation10], 0  ;;  %s30_s17 = sshll.u32 %s2025_s1, 4  ;;  %s31_s17 = int_to_ptr.hbm [resolvable:$true] %s30_s17 }
   0x3   :  { %12 = vsyncpa [#allocation5], 0  ;;  %s1773_s18 = smov [#allocation6]   ;;  %s17_s22 = sshll.u32 %s2024_s0, 4  ;;  %s18_s22 = int_to_ptr.hbm [resolvable:$true] %s17_s22 }
   0x4   :  { %s32_s19 = sshll.u32 %s1773_s18, 4  ;;  %s1774_s23 = smov 256   ;;  %s33_s19 = int_to_ptr.vmem [resolvable:$true] %s32_s19 }
   0x5   :  { %s1775_s24 = smov 16   ;;  %s1776_s25 = smov [#allocation3]  }
   0x6   :  { %38 = dma.hbm_to_vmem [thread:$0]  %s31_s17, 4096, %s33_s19, [#allocation7], %s1774_s23, %s1774_s23, %s1775_s24  }
   0x7   :  { %s19_s26 = sshll.u32 %s1776_s25, 4  ;;  %s1777_s27 = smov 64   ;;  %s20_s26 = int_to_ptr.vmem [resolvable:$true] %s19_s26 }
   0x8   :  { %s1778_s28 = smov 4   ;;  %s43_s30 = sshll.u32 %s2026_s2, 4  ;;  %s44_s30 = int_to_ptr.hbm [resolvable:$true] %s43_s30 }
   0x9   :  { %25 = dma.hbm_to_vmem [thread:$0]  %s18_s22, 128, %s20_s26, [#allocation4], %s1777_s27, %s1777_s27, %s1778_s28  }
   0xa   :  { %s1779_s5 = smov [#allocation8]   ;;  %s56_s8 = sshll.u32 %s2027_s3, 4  ;;  %s57_s8 = int_to_ptr.hbm [resolvable:$true] %s56_s8 }
   0xb   :  { %s45_s6 = sshll.u32 %s1779_s5, 4  ;;  %s1780_s9 = smov [#allocation9]   ;;  %s46_s6 = int_to_ptr.vmem [resolvable:$true] %s45_s6 }
   0xc   :  { %51 = dma.hbm_to_vmem [thread:$0]  %s44_s30, 4096, %s46_s6, [#allocation7], %s1774_s23, %s1774_s23, %s1775_s24  }
   0xd   :  { %s58_s10 = sshll.u32 %s1780_s9, 4  ;;  %s59_s10 = int_to_ptr.vmem [resolvable:$true] %s58_s10 }
   0xe   :  { %64 = dma.hbm_to_vmem [thread:$0]  %s57_s8, 4096, %s59_s10, [#allocation10], %s1777_s27, %s1777_s27, %s1778_s28  }
   0xf   :  { %1765 = dma.done.wait [#allocation4], 128  }
  0x10   :  { %1766 = vsyncadd [#allocation4], 4294967168 }
  0x11   :  { %1767 = dma.done.wait [#allocation7], 8192  }
  0x12   :  { %1768 = vsyncadd [#allocation7], 4294959104 }
  0x13   :  { %1769 = dma.done.wait [#allocation10], 4096  }
  0x14   :  { %1770 = vsyncadd [#allocation10], 4294963200  ;;  %v1227_v0 = vld [vmem:[#allocation6 + $0xe0] sm:$0xf]  ;;  %v1536_v1 = vld [vmem:[#allocation6 + $0xec] sm:$0xf0] }
  0x15   :  { %v1534_v2 = vld [vmem:[#allocation6 + $0xe4] sm:$0xf]  ;;  %v1228_v3 = vor.u32 %v1536_v1, %v1227_v0  ;;  %v1229_v4 = vld [vmem:[#allocation6 + $0xf0] sm:$0xf0]  ;;  %v1235_v5 = vld [vmem:[#allocation6 + $0xe8] sm:$0xf] }
  0x16   :  { %v1537_v6 = vld [vmem:[#allocation6 + $0xf4] sm:$0xf0]  ;;  %v1232_v7 = vor.u32 %v1534_v2, %v1229_v4  ;;  %v1535_v9 = vld [vmem:[#allocation6 + $0xec] sm:$0xf]  ;;  %v1237_v10 = vld [vmem:[#allocation6 + $0xf8] sm:$0xf0] }
  0x17   :  { %v1236_v8 = vor.u32 %v1537_v6, %v1235_v5  ;;  %v1211_v11 = vld [vmem:[#allocation6 + $0xc0] sm:$0xf]  ;;  %287 = vmatpush.bf16.msra.mxu0 %v1228_v3  ;;  %v1240_v12 = vor.u32 %v1535_v9, %v1237_v10  ;;  %v1532_v13 = vld [vmem:[#allocation6 + $0xcc] sm:$0xf0]  ;;  %v1530_v14 = vld [vmem:[#allocation6 + $0xc4] sm:$0xf] }
  0x18   :  { %v1213_v15 = vld [vmem:[#allocation6 + $0xd0] sm:$0xf0]  ;;  %301 = vmatpush.bf16.msra.mxu1 %v1232_v7  ;;  %v1212_v16 = vor.u32 %v1532_v13, %v1211_v11  ;;  %v1219_v18 = vld [vmem:[#allocation6 + $0xc8] sm:$0xf]  ;;  %v1533_v19 = vld [vmem:[#allocation6 + $0xd4] sm:$0xf0] }
  0x19   :  { %315 = vmatpush.bf16.msra.mxu2 %v1236_v8  ;;  %v1216_v17 = vor.u32 %v1530_v14, %v1213_v15  ;;  %v1531_v20 = vld [vmem:[#allocation6 + $0xcc] sm:$0xf]  ;;  %329 = vmatpush.bf16.msra.mxu3 %v1240_v12  ;;  %v1220_v21 = vor.u32 %v1533_v19, %v1219_v18  ;;  %v1221_v22 = vld [vmem:[#allocation6 + $0xd8] sm:$0xf0]  ;;  %v1195_v23 = vld [vmem:[#allocation6 + $0xa0] sm:$0xf] }
  0x1a   :  { %v1528_v24 = vld [vmem:[#allocation6 + $0xac] sm:$0xf0]  ;;  %v1224_v25 = vor.u32 %v1531_v20, %v1221_v22  ;;  %v1526_v26 = vld [vmem:[#allocation6 + $0xa4] sm:$0xf]  ;;  %v1197_v27 = vld [vmem:[#allocation6 + $0xb0] sm:$0xf0] }
  0x1b   :  { %v1203_v28 = vld [vmem:[#allocation6 + $0xa8] sm:$0xf]  ;;  %288 = vmatpush.bf16.msra.mxu0 %v1212_v16  ;;  %v1196_v29 = vor.u32 %v1528_v24, %v1195_v23  ;;  %v1529_v30 = vld [vmem:[#allocation6 + $0xb4] sm:$0xf0]  ;;  %v1527_v31 = vld [vmem:[#allocation6 + $0xac] sm:$0xf]  ;;  %v1200_v33 = vor.u32 %v1526_v26, %v1197_v27 }
  0x1c   :  { %v1205_v32 = vld [vmem:[#allocation6 + $0xb8] sm:$0xf0]  ;;  %302 = vmatpush.bf16.msra.mxu1 %v1216_v17  ;;  %v1204_v34 = vor.u32 %v1529_v30, %v1203_v28  ;;  %v1179_v35 = vld [vmem:[#allocation6 + $0x80] sm:$0xf]  ;;  %v1524_v36 = vld [vmem:[#allocation6 + $0x8c] sm:$0xf0] }
  0x1d   :  { %316 = vmatpush.bf16.msra.mxu2 %v1220_v21  ;;  %v1522_v37 = vld [vmem:[#allocation6 + $0x84] sm:$0xf]  ;;  %330 = vmatpush.bf16.msra.mxu3 %v1224_v25  ;;  %v1208_v38 = vor.u32 %v1527_v31, %v1205_v32  ;;  %v1181_v39 = vld [vmem:[#allocation6 + $0x90] sm:$0xf0]  ;;  %v1187_v40 = vld [vmem:[#allocation6 + $0x88] sm:$0xf]  ;;  %v1180_v44 = vor.u32 %v1524_v36, %v1179_v35 }
  0x1e   :  { %v1525_v41 = vld [vmem:[#allocation6 + $0x94] sm:$0xf0]  ;;  %v1523_v42 = vld [vmem:[#allocation6 + $0x8c] sm:$0xf]  ;;  %v1189_v43 = vld [vmem:[#allocation6 + $0x98] sm:$0xf0]  ;;  %v1184_v45 = vor.u32 %v1522_v37, %v1181_v39 }
  0x1f   :  { %289 = vmatpush.bf16.msra.mxu0 %v1196_v29  ;;  %v1188_v46 = vor.u32 %v1525_v41, %v1187_v40  ;;  %v1163_v47 = vld [vmem:[#allocation6 + $0x60] sm:$0xf]  ;;  %v1520_v48 = vld [vmem:[#allocation6 + $0x6c] sm:$0xf0]  ;;  %v1518_v49 = vld [vmem:[#allocation6 + $0x64] sm:$0xf]  ;;  %v1192_v50 = vor.u32 %v1523_v42, %v1189_v43 }
  0x20   :  { %303 = vmatpush.bf16.msra.mxu1 %v1200_v33  ;;  %v1165_v51 = vld [vmem:[#allocation6 + $0x70] sm:$0xf0]  ;;  %v1171_v52 = vld [vmem:[#allocation6 + $0x68] sm:$0xf]  ;;  %v1521_v53 = vld [vmem:[#allocation6 + $0x74] sm:$0xf0]  ;;  %v1164_v56 = vor.u32 %v1520_v48, %v1163_v47 }
  0x21   :  { %317 = vmatpush.bf16.msra.mxu2 %v1204_v34  ;;  %331 = vmatpush.bf16.msra.mxu3 %v1208_v38  ;;  %v1519_v54 = vld [vmem:[#allocation6 + $0x6c] sm:$0xf]  ;;  %v1173_v55 = vld [vmem:[#allocation6 + $0x78] sm:$0xf0]  ;;  %v1168_v57 = vor.u32 %v1518_v49, %v1165_v51  ;;  %v1172_v58 = vor.u32 %v1521_v53, %v1171_v52  ;;  %v1147_v59 = vld [vmem:[#allocation6 + $0x40] sm:$0xf] }
  0x22   :  { %v1516_v60 = vld [vmem:[#allocation6 + $0x4c] sm:$0xf0]  ;;  %v1514_v61 = vld [vmem:[#allocation6 + $0x44] sm:$0xf]  ;;  %v1176_v62 = vor.u32 %v1519_v54, %v1173_v55  ;;  %v1149_v63 = vld [vmem:[#allocation6 + $0x50] sm:$0xf0] }
  0x23   :  { %290 = vmatpush.bf16.msra.mxu0 %v1180_v44  ;;  %v1155_v0 = vld [vmem:[#allocation6 + $0x48] sm:$0xf]  ;;  %v1517_v1 = vld [vmem:[#allocation6 + $0x54] sm:$0xf0]  ;;  %v1515_v2 = vld [vmem:[#allocation6 + $0x4c] sm:$0xf]  ;;  %v1148_v4 = vor.u32 %v1516_v60, %v1147_v59  ;;  %v1152_v5 = vor.u32 %v1514_v61, %v1149_v63 }
  0x24   :  { %304 = vmatpush.bf16.msra.mxu1 %v1184_v45  ;;  %v1157_v3 = vld [vmem:[#allocation6 + $0x58] sm:$0xf0]  ;;  %v1156_v6 = vor.u32 %v1517_v1, %v1155_v0  ;;  %v1131_v7 = vld [vmem:[#allocation6 + $0x20] sm:$0xf]  ;;  %v1512_v8 = vld [vmem:[#allocation6 + $0x2c] sm:$0xf0] }
  0x25   :  { %318 = vmatpush.bf16.msra.mxu2 %v1188_v46  ;;  %332 = vmatpush.bf16.msra.mxu3 %v1192_v50  ;;  %v1510_v9 = vld [vmem:[#allocation6 + $0x24] sm:$0xf]  ;;  %v1160_v10 = vor.u32 %v1515_v2, %v1157_v3  ;;  %v1133_v11 = vld [vmem:[#allocation6 + $0x30] sm:$0xf0]  ;;  %v1139_v12 = vld [vmem:[#allocation6 + $0x28] sm:$0xf]  ;;  %v1132_v16 = vor.u32 %v1512_v8, %v1131_v7 }
  0x26   :  { %v1513_v13 = vld [vmem:[#allocation6 + $0x34] sm:$0xf0]  ;;  %v1511_v14 = vld [vmem:[#allocation6 + $0x2c] sm:$0xf]  ;;  %v1141_v15 = vld [vmem:[#allocation6 + $0x38] sm:$0xf0]  ;;  %v1136_v19 = vor.u32 %v1510_v9, %v1133_v11 }
  0x27   :  { %291 = vmatpush.bf16.msra.mxu0 %v1164_v56  ;;  %v1115_v17 = vld [vmem:[#allocation6] sm:$0xf]  ;;  %v1508_v18 = vld [vmem:[#allocation6 + $0xc] sm:$0xf0]  ;;  %v1140_v20 = vor.u32 %v1513_v13, %v1139_v12  ;;  %v1506_v21 = vld [vmem:[#allocation6 + $0x4] sm:$0xf]  ;;  %v1144_v24 = vor.u32 %v1511_v14, %v1141_v15 }
  0x28   :  { %305 = vmatpush.bf16.msra.mxu1 %v1168_v57  ;;  %v1117_v22 = vld [vmem:[#allocation6 + $0x10] sm:$0xf0]  ;;  %v1123_v23 = vld [vmem:[#allocation6 + $0x8] sm:$0xf]  ;;  %v1509_v25 = vld [vmem:[#allocation6 + $0x14] sm:$0xf0]  ;;  %v1116_v31 = vor.u32 %v1508_v18, %v1115_v17 }
  0x29   :  { %319 = vmatpush.bf16.msra.mxu2 %v1172_v58  ;;  %333 = vmatpush.bf16.msra.mxu3 %v1176_v62  ;;  %v1507_v26 = vld [vmem:[#allocation6 + $0xc] sm:$0xf]  ;;  %v1125_v27 = vld [vmem:[#allocation6 + $0x18] sm:$0xf0]  ;;  %v1363_v28 = vld [vmem:[#allocation8 + $0xe8] sm:$0xf]  ;;  %v1120_v35 = vor.u32 %v1506_v21, %v1117_v22  ;;  %v1124_v36 = vor.u32 %v1509_v25, %v1123_v23 }
  0x2a   :  { %v1569_v29 = vld [vmem:[#allocation8 + $0xf4] sm:$0xf0]  ;;  %v1567_v30 = vld [vmem:[#allocation8 + $0xec] sm:$0xf]  ;;  %v1365_v32 = vld [vmem:[#allocation8 + $0xf8] sm:$0xf0]  ;;  %v1128_v39 = vor.u32 %v1507_v26, %v1125_v27 }
  0x2b   :  { %292 = vmatpush.bf16.msra.mxu0 %v1148_v4  ;;  %v1355_v33 = vld [vmem:[#allocation8 + $0xe0] sm:$0xf]  ;;  %v1568_v34 = vld [vmem:[#allocation8 + $0xec] sm:$0xf0]  ;;  %v1566_v37 = vld [vmem:[#allocation8 + $0xe4] sm:$0xf]  ;;  %v1364_v40 = vor.u32 %v1569_v29, %v1363_v28  ;;  %v1368_v42 = vor.u32 %v1567_v30, %v1365_v32 }
  0x2c   :  { %306 = vmatpush.bf16.msra.mxu1 %v1152_v5  ;;  %v1357_v38 = vld [vmem:[#allocation8 + $0xf0] sm:$0xf0]  ;;  %v1821_v41 = vld [vmem:[#allocation3] sm:$0xff]  ;;  %v1356_v43 = vor.u32 %v1568_v34, %v1355_v33  ;;  %v1347_v44 = vld [vmem:[#allocation8 + $0xc8] sm:$0xf]  ;;  %s1781_s2 = smov [#allocation11]  }
  0x2d   :  { %320 = vmatpush.bf16.msra.mxu2 %v1156_v6  ;;  %334 = vmatpush.bf16.msra.mxu3 %v1160_v10  ;;  %v1565_v45 = vld [vmem:[#allocation8 + $0xd4] sm:$0xf0]  ;;  %v1563_v46 = vld [vmem:[#allocation8 + $0xcc] sm:$0xf]  ;;  %v1360_v47 = vor.u32 %v1566_v37, %v1357_v38  ;;  %v1349_v48 = vld [vmem:[#allocation8 + $0xd8] sm:$0xf0] }
  0x2e   :  { %v1339_v49 = vld [vmem:[#allocation8 + $0xc0] sm:$0xf]  ;;  %v1564_v50 = vld [vmem:[#allocation8 + $0xcc] sm:$0xf0]  ;;  %v1562_v51 = vld [vmem:[#allocation8 + $0xc4] sm:$0xf]  ;;  %v1348_v53 = vor.u32 %v1565_v45, %v1347_v44  ;;  %v1352_v54 = vor.u32 %v1563_v46, %v1349_v48 }
  0x2f   :  { %293 = vmatpush.bf16.msra.mxu0 %v1132_v16  ;;  %v1341_v52 = vld [vmem:[#allocation8 + $0xd0] sm:$0xf0]  ;;  %v1340_v55 = vor.u32 %v1564_v50, %v1339_v49  ;;  %v1331_v56 = vld [vmem:[#allocation8 + $0xa8] sm:$0xf]  ;;  %v1561_v57 = vld [vmem:[#allocation8 + $0xb4] sm:$0xf0] }
  0x30   :  { %307 = vmatpush.bf16.msra.mxu1 %v1136_v19  ;;  %v1559_v58 = vld [vmem:[#allocation8 + $0xac] sm:$0xf]  ;;  %v1344_v59 = vor.u32 %v1562_v51, %v1341_v52  ;;  %v1333_v60 = vld [vmem:[#allocation8 + $0xb8] sm:$0xf0]  ;;  %v1323_v61 = vld [vmem:[#allocation8 + $0xa0] sm:$0xf]  ;;  %v1332_v1 = vor.u32 %v1561_v57, %v1331_v56 }
  0x31   :  { %321 = vmatpush.bf16.msra.mxu2 %v1140_v20  ;;  %335 = vmatpush.bf16.msra.mxu3 %v1144_v24  ;;  %v1560_v62 = vld [vmem:[#allocation8 + $0xac] sm:$0xf0]  ;;  %v1558_v63 = vld [vmem:[#allocation8 + $0xa4] sm:$0xf]  ;;  %v1325_v0 = vld [vmem:[#allocation8 + $0xb0] sm:$0xf0]  ;;  %v1336_v2 = vor.u32 %v1559_v58, %v1333_v60 }
  0x32   :  { %v1324_v3 = vor.u32 %v1560_v62, %v1323_v61  ;;  %v1315_v4 = vld [vmem:[#allocation8 + $0x88] sm:$0xf]  ;;  %v1557_v5 = vld [vmem:[#allocation8 + $0x94] sm:$0xf0]  ;;  %v1555_v6 = vld [vmem:[#allocation8 + $0x8c] sm:$0xf]  ;;  %v1328_v7 = vor.u32 %v1558_v63, %v1325_v0 }
  0x33   :  { %294 = vmatpush.bf16.msra.mxu0 %v1116_v31  ;;  %v1317_v8 = vld [vmem:[#allocation8 + $0x98] sm:$0xf0]  ;;  %v1307_v9 = vld [vmem:[#allocation8 + $0x80] sm:$0xf]  ;;  %v1556_v10 = vld [vmem:[#allocation8 + $0x8c] sm:$0xf0]  ;;  %v1316_v13 = vor.u32 %v1557_v5, %v1315_v4 }
  0x34   :  { %308 = vmatpush.bf16.msra.mxu1 %v1120_v35  ;;  %v1554_v11 = vld [vmem:[#allocation8 + $0x84] sm:$0xf]  ;;  %v1309_v12 = vld [vmem:[#allocation8 + $0x90] sm:$0xf0]  ;;  %v1320_v14 = vor.u32 %v1555_v6, %v1317_v8  ;;  %v1308_v15 = vor.u32 %v1556_v10, %v1307_v9  ;;  %v1299_v16 = vld [vmem:[#allocation8 + $0x68] sm:$0xf] }
  0x35   :  { %322 = vmatpush.bf16.msra.mxu2 %v1124_v36  ;;  %336 = vmatpush.bf16.msra.mxu3 %v1128_v39  ;;  %v1553_v17 = vld [vmem:[#allocation8 + $0x74] sm:$0xf0]  ;;  %v1551_v18 = vld [vmem:[#allocation8 + $0x6c] sm:$0xf]  ;;  %v1312_v19 = vor.u32 %v1554_v11, %v1309_v12  ;;  %v1301_v20 = vld [vmem:[#allocation8 + $0x78] sm:$0xf0] }
  0x36   :  { %295 = vmatmul.bf16.vlgmr.msra.gmra.mxu0 %v1821_v41  ;;  %v1291_v21 = vld [vmem:[#allocation8 + $0x60] sm:$0xf]  ;;  %v1552_v22 = vld [vmem:[#allocation8 + $0x6c] sm:$0xf0]  ;;  %v1550_v23 = vld [vmem:[#allocation8 + $0x64] sm:$0xf]  ;;  %v1300_v25 = vor.u32 %v1553_v17, %v1299_v16  ;;  %v1304_v26 = vor.u32 %v1551_v18, %v1301_v20 }
  0x37   :  { %535 = vmatpush.bf16.msrb.mxu0 %v1356_v43  ;;  %309 = vmatmul.bf16.vlgmr.msra.gmra.mxu1 %v1821_v41  ;;  %v1293_v24 = vld [vmem:[#allocation8 + $0x70] sm:$0xf0]  ;;  %v1292_v27 = vor.u32 %v1552_v22, %v1291_v21  ;;  %v1283_v28 = vld [vmem:[#allocation8 + $0x48] sm:$0xf]  ;;  %v1549_v29 = vld [vmem:[#allocation8 + $0x54] sm:$0xf0] }
  0x38   :  { %549 = vmatpush.bf16.msrb.mxu1 %v1360_v47  ;;  %323 = vmatmul.bf16.vlgmr.msra.gmra.mxu2 %v1821_v41  ;;  %v1547_v30 = vld [vmem:[#allocation8 + $0x4c] sm:$0xf]  ;;  %v1296_v31 = vor.u32 %v1550_v23, %v1293_v24  ;;  %v1285_v32 = vld [vmem:[#allocation8 + $0x58] sm:$0xf0]  ;;  %v1275_v33 = vld [vmem:[#allocation8 + $0x40] sm:$0xf]  ;;  %v1284_v37 = vor.u32 %v1549_v29, %v1283_v28 }
  0x39   :  { %563 = vmatpush.bf16.msrb.mxu2 %v1364_v40  ;;  %577 = vmatpush.bf16.msrb.mxu3 %v1368_v42  ;;  %v1548_v34 = vld [vmem:[#allocation8 + $0x4c] sm:$0xf0]  ;;  %v1546_v35 = vld [vmem:[#allocation8 + $0x44] sm:$0xf]  ;;  %v1277_v36 = vld [vmem:[#allocation8 + $0x50] sm:$0xf0]  ;;  %v1288_v38 = vor.u32 %v1547_v30, %v1285_v32 }
  0x3a   :  { %337 = vmatmul.bf16.vlgmr.msra.gmra.mxu3 %v1821_v41  ;;  %v1276_v39 = vor.u32 %v1548_v34, %v1275_v33  ;;  %v1267_v40 = vld [vmem:[#allocation8 + $0x28] sm:$0xf]  ;;  %v1545_v42 = vld [vmem:[#allocation8 + $0x34] sm:$0xf0]  ;;  %v1543_v43 = vld [vmem:[#allocation8 + $0x2c] sm:$0xf]  ;;  %v1280_v44 = vor.u32 %v1546_v35, %v1277_v36 }
  0x3b   :  { %536 = vmatpush.bf16.msrb.mxu0 %v1340_v55  ;;  %v1269_v45 = vld [vmem:[#allocation8 + $0x38] sm:$0xf0]  ;;  %v1259_v46 = vld [vmem:[#allocation8 + $0x20] sm:$0xf]  ;;  %v1544_v47 = vld [vmem:[#allocation8 + $0x2c] sm:$0xf0]  ;;  %v1268_v50 = vor.u32 %v1545_v42, %v1267_v40 }
  0x3c   :  { %550 = vmatpush.bf16.msrb.mxu1 %v1344_v59  ;;  %v1542_v48 = vld [vmem:[#allocation8 + $0x24] sm:$0xf]  ;;  %v1261_v49 = vld [vmem:[#allocation8 + $0x30] sm:$0xf0]  ;;  %v1272_v51 = vor.u32 %v1543_v43, %v1269_v45  ;;  %v1260_v52 = vor.u32 %v1544_v47, %v1259_v46  ;;  %v1539_v55 = vld [vmem:[#allocation8 + $0xc] sm:$0xf] }
  0x3d   :  { %564 = vmatpush.bf16.msrb.mxu2 %v1348_v53  ;;  %578 = vmatpush.bf16.msrb.mxu3 %v1352_v54  ;;  %v1251_v53 = vld [vmem:[#allocation8 + $0x8] sm:$0xf]  ;;  %v1541_v54 = vld [vmem:[#allocation8 + $0x14] sm:$0xf0]  ;;  %v1264_v56 = vor.u32 %v1542_v48, %v1261_v49  ;;  %v1253_v57 = vld [vmem:[#allocation8 + $0x18] sm:$0xf0] }
  0x3e   :  { %v1243_v58 = vld [vmem:[#allocation8] sm:$0xf]  ;;  %v1540_v59 = vld [vmem:[#allocation8 + $0xc] sm:$0xf0]  ;;  %v1538_v60 = vld [vmem:[#allocation8 + $0x4] sm:$0xf]  ;;  %v1252_v62 = vor.u32 %v1541_v54, %v1251_v53  ;;  %v1256_v63 = vor.u32 %v1539_v55, %v1253_v57 }
  0x3f   :  { %537 = vmatpush.bf16.msrb.mxu0 %v1324_v3  ;;  %v1245_v61 = vld [vmem:[#allocation8 + $0x10] sm:$0xf0]  ;;  %v1244_v0 = vor.u32 %v1540_v59, %v1243_v58  ;;  %v1585_v3 = vld [vmem:[#allocation9 + $0x78] sm:$0xff]  ;;  %v1575_v8 = vld [vmem:[#allocation9 + $0x28] sm:$0xff]  ;;  %s1092_s3 = sshll.u32 %s1781_s2, 4  ;;  %s1094_s13 = sshll.u32 %s2028_s4, 4  ;;  %s1093_s3 = int_to_ptr.vmem [resolvable:$true] %s1092_s3  ;;  %s1095_s13 = int_to_ptr.hbm [resolvable:$true] %s1094_s13 }
  0x40   :  { %551 = vmatpush.bf16.msrb.mxu1 %v1328_v7  ;;  %v1576_v4 = vld [vmem:[#allocation9 + $0x30] sm:$0xff]  ;;  %v1593_v6 = vld [vmem:[#allocation9 + $0xb8] sm:$0xff]  ;;  %v1583_v9 = vld [vmem:[#allocation9 + $0x68] sm:$0xff]  ;;  %s1782_s14 = smov 128   ;;  %s1783_s15 = smov 8  }
  0x41   :  { %565 = vmatpush.bf16.msrb.mxu2 %v1332_v1  ;;  %579 = vmatpush.bf16.msrb.mxu3 %v1336_v2  ;;  %v1248_v1 = vor.u32 %v1538_v60, %v1245_v61  ;;  %v1577_v2 = vld [vmem:[#allocation9 + $0x38] sm:$0xff]  ;;  %v1584_v5 = vld [vmem:[#allocation9 + $0x70] sm:$0xff]  ;;  %v1582_v16 = vld [vmem:[#allocation9 + $0x60] sm:$0xff] }
  0x42   :  { %v1601_v7 = vld [vmem:[#allocation9 + $0xf8] sm:$0xff]  ;;  %v1591_v17 = vld [vmem:[#allocation9 + $0xa8] sm:$0xff]  ;;  %v1590_v28 = vld [vmem:[#allocation9 + $0xa0] sm:$0xff] }
  0x43   :  { %538 = vmatpush.bf16.msrb.mxu0 %v1308_v15  ;;  %v1574_v15 = vld [vmem:[#allocation9 + $0x20] sm:$0xff]  ;;  %v1599_v18 = vld [vmem:[#allocation9 + $0xe8] sm:$0xff]  ;;  %v1573_v20 = vld [vmem:[#allocation9 + $0x18] sm:$0xff] }
  0x44   :  { %552 = vmatpush.bf16.msrb.mxu1 %v1312_v19  ;;  %v1581_v21 = vld [vmem:[#allocation9 + $0x58] sm:$0xff]  ;;  %v1598_v29 = vld [vmem:[#allocation9 + $0xe0] sm:$0xff]  ;;  %v1572_v35 = vld [vmem:[#allocation9 + $0x10] sm:$0xff] }
  0x45   :  { %566 = vmatpush.bf16.msrb.mxu2 %v1316_v13  ;;  %580 = vmatpush.bf16.msrb.mxu3 %v1320_v14  ;;  %v1600_v13 = vld [vmem:[#allocation9 + $0xf0] sm:$0xff]  ;;  %v1571_v40 = vld [vmem:[#allocation9 + $0x8] sm:$0xff]  ;;  %v1570_v54 = vld [vmem:[#allocation9] sm:$0xff] }
  0x46   :  { %v1580_v36 = vld [vmem:[#allocation9 + $0x50] sm:$0xff]  ;;  %v1579_v42 = vld [vmem:[#allocation9 + $0x48] sm:$0xff]  ;;  %v1578_v55 = vld [vmem:[#allocation9 + $0x40] sm:$0xff] }
  0x47   :  { %539 = vmatpush.bf16.msrb.mxu0 %v1292_v27  ;;  %v1588_v47 = vld [vmem:[#allocation9 + $0x90] sm:$0xff]  ;;  %v1587_v61 = vld [vmem:[#allocation9 + $0x88] sm:$0xff] }
  0x48   :  { %553 = vmatpush.bf16.msrb.mxu1 %v1296_v31  ;;  %v1596_v48 = vld [vmem:[#allocation9 + $0xd0] sm:$0xff] }
  0x49   :  { %567 = vmatpush.bf16.msrb.mxu2 %v1300_v25  ;;  %581 = vmatpush.bf16.msrb.mxu3 %v1304_v26 }
  0x4b   :  { %540 = vmatpush.bf16.msrb.mxu0 %v1276_v39 }
  0x4c   :  { %554 = vmatpush.bf16.msrb.mxu1 %v1280_v44 }
  0x4d   :  { %568 = vmatpush.bf16.msrb.mxu2 %v1284_v37  ;;  %582 = vmatpush.bf16.msrb.mxu3 %v1288_v38  ;;  %v1589_v37 = vld [vmem:[#allocation9 + $0x98] sm:$0xff] }
  0x4e   :  { %v1597_v38 = vld [vmem:[#allocation9 + $0xd8] sm:$0xff] }
  0x4f   :  { %541 = vmatpush.bf16.msrb.mxu0 %v1260_v52 }
  0x50   :  { %555 = vmatpush.bf16.msrb.mxu1 %v1264_v56 }
  0x51   :  { %569 = vmatpush.bf16.msrb.mxu2 %v1268_v50  ;;  %583 = vmatpush.bf16.msrb.mxu3 %v1272_v51 }
  0x53   :  { %542 = vmatpush.bf16.msrb.mxu0 %v1244_v0 }
  0x54   :  { %556 = vmatpush.bf16.msrb.mxu1 %v1248_v1 }
  0x55   :  { %570 = vmatpush.bf16.msrb.mxu2 %v1252_v62  ;;  %584 = vmatpush.bf16.msrb.mxu3 %v1256_v63  ;;  %v1595_v62 = vld [vmem:[#allocation9 + $0xc8] sm:$0xff] }
  0x56   :  { %543 = vmatmul.bf16.vlgmr.msrb.gmra.mxu0 %v1821_v41 }
  0x57   :  { %557 = vmatmul.bf16.vlgmr.msrb.gmra.mxu1 %v1821_v41  ;;  %1021 = vmatpush.bf16.msra.mxu0 %v1577_v2 }
  0x58   :  { %571 = vmatmul.bf16.vlgmr.msrb.gmra.mxu2 %v1821_v41  ;;  %585 = vmatmul.bf16.vlgmr.msrb.gmra.mxu3 %v1821_v41  ;;  %v1592_v41 = vld [vmem:[#allocation9 + $0xb0] sm:$0xff] }
  0x59   :  { %1035 = vmatpush.bf16.msra.mxu1 %v1585_v3  ;;  %1049 = vmatpush.bf16.msra.mxu2 %v1593_v6 }
  0x5a   :  { %1063 = vmatpush.bf16.msra.mxu3 %v1601_v7 }
  0x5b   :  { %1022 = vmatpush.bf16.msra.mxu0 %v1576_v4 }
  0x5d   :  { %1036 = vmatpush.bf16.msra.mxu1 %v1584_v5  ;;  %1050 = vmatpush.bf16.msra.mxu2 %v1592_v41 }
  0x5e   :  { %1064 = vmatpush.bf16.msra.mxu3 %v1600_v13 }
  0x5f   :  { %1023 = vmatpush.bf16.msra.mxu0 %v1575_v8  ;;  %v1586_v8 = vld [vmem:[#allocation9 + $0x80] sm:$0xff] }
  0x61   :  { %1037 = vmatpush.bf16.msra.mxu1 %v1583_v9  ;;  %1051 = vmatpush.bf16.msra.mxu2 %v1591_v17  ;;  %v1594_v9 = vld [vmem:[#allocation9 + $0xc0] sm:$0xff] }
  0x62   :  { %1065 = vmatpush.bf16.msra.mxu3 %v1599_v18 }
  0x63   :  { %1024 = vmatpush.bf16.msra.mxu0 %v1574_v15 }
  0x65   :  { %1038 = vmatpush.bf16.msra.mxu1 %v1582_v16  ;;  %1052 = vmatpush.bf16.msra.mxu2 %v1590_v28 }
  0x66   :  { %1066 = vmatpush.bf16.msra.mxu3 %v1598_v29 }
  0x67   :  { %1025 = vmatpush.bf16.msra.mxu0 %v1573_v20 }
  0x69   :  { %1039 = vmatpush.bf16.msra.mxu1 %v1581_v21  ;;  %1053 = vmatpush.bf16.msra.mxu2 %v1589_v37 }
  0x6a   :  { %1067 = vmatpush.bf16.msra.mxu3 %v1597_v38 }
  0x6b   :  { %1026 = vmatpush.bf16.msra.mxu0 %v1572_v35 }
  0x6d   :  { %1040 = vmatpush.bf16.msra.mxu1 %v1580_v36  ;;  %1054 = vmatpush.bf16.msra.mxu2 %v1588_v47 }
  0x6e   :  { %1068 = vmatpush.bf16.msra.mxu3 %v1596_v48 }
  0x6f   :  { %1027 = vmatpush.bf16.msra.mxu0 %v1571_v40 }
  0x71   :  { %1041 = vmatpush.bf16.msra.mxu1 %v1579_v42  ;;  %1055 = vmatpush.bf16.msra.mxu2 %v1587_v61 }
  0x72   :  { %1069 = vmatpush.bf16.msra.mxu3 %v1595_v62 }
  0x73   :  { %1028 = vmatpush.bf16.msra.mxu0 %v1570_v54 }
  0x75   :  { %1042 = vmatpush.bf16.msra.mxu1 %v1578_v55  ;;  %1056 = vmatpush.bf16.msra.mxu2 %v1586_v8 }
  0x76   :  { %1070 = vmatpush.bf16.msra.mxu3 %v1594_v9 }
  0xb3   :  { %v1831_v10 = vpop.f32.mrf.mxu0 }
  0xb4   :  { %v1369_v11 = vmul.f32 -1.442695, %v1831_v10  ;;  %v1834_v12 = vpop.f32.mrf.mxu1 }
  0xb5   :  { %v1370_v14 = vmul.f32 -1.442695, %v1834_v12 }
  0xb6   :  { %1613 = vpow2.f32 %v1369_v11 }
  0xb7   :  { %1615 = vpow2.f32 %v1370_v14 }
  0xbb   :  { %v1837_v19 = vpop.f32.mrf.mxu2  ;;  %v1842_v24 = vpop.f32.mrf.mxu0 }
  0xbc   :  { %v1371_v22 = vmul.f32 -1.442695, %v1837_v19  ;;  %v1614_v25 = vpop.eup %1613  ;;  %v1845_v27 = vpop.f32.mrf.mxu1  ;;  %v1373_v32 = vmul.f32 -1.442695, %v1842_v24 }
  0xbd   :  { %v1840_v23 = vpop.f32.mrf.mxu3  ;;  %v1616_v30 = vpop.eup %1615  ;;  %v1847_v31 = vadd.f32 1.0, %v1614_v25  ;;  %v1374_v34 = vmul.f32 -1.442695, %v1845_v27 }
  0xbe   :  { %v1372_v26 = vmul.f32 -1.442695, %v1840_v23  ;;  %1617 = vpow2.f32 %v1371_v22  ;;  %v1850_v33 = vadd.f32 1.0, %v1616_v30 }
  0xbf   :  { %vm628_vm0 = vweird.f32 %v1847_v31  ;;  %v632_v3 = vand.u32 2147483647, %v1847_v31  ;;  %v634_v6 = vand.u32 2147483648, %v1847_v31 }
  0xc0   :  { %1619 = vpow2.f32 %v1372_v26  ;;  %vm643_vm1 = vweird.f32 %v1850_v33  ;;  %v647_v7 = vand.u32 2147483647, %v1850_v33  ;;  %v649_v11 = vand.u32 2147483648, %v1850_v33 }
  0xc1   :  { %1621 = vrcp.f32 %v1847_v31  ;;  %vm1904_vm4 = vcmp.eq.f32.partialorder %v632_v3, 8.507059e+37  ;;  %v635_v26 = vor.u32 1.1754944e-38, %v634_v6 }
  0xc2   :  { %1623 = vrcp.f32 %v1850_v33  ;;  %vm1908_vm5 = vcmp.eq.f32.partialorder %v647_v7, 8.507059e+37 }
  0xc3   :  { %1625 = vpow2.f32 %v1373_v32  ;;  %v1855_v39 = vpop.f32.mrf.mxu2  ;;  %v650_v32 = vor.u32 1.1754944e-38, %v649_v11 }
  0xc4   :  { %1627 = vpow2.f32 %v1374_v34  ;;  %v1618_v43 = vpop.eup %1617  ;;  %v1375_v51 = vmul.f32 -1.442695, %v1855_v39 }
  0xc5   :  { %v1857_v45 = vadd.f32 1.0, %v1618_v43  ;;  %v1859_v46 = vpop.f32.mrf.mxu3 }
  0xc6   :  { %v1620_v44 = vpop.eup %1619  ;;  %v1376_v58 = vmul.f32 -1.442695, %v1859_v46 }
  0xc7   :  { %v1861_v49 = vpop.eup %1621  ;;  %v1863_v50 = vadd.f32 1.0, %v1620_v44  ;;  %1629 = vrcp.f32 %v1857_v45  ;;  %v662_v14 = vand.u32 2147483647, %v1857_v45  ;;  %v664_v15 = vand.u32 2147483648, %v1857_v45 }
  0xc8   :  { %v1866_v52 = vpop.eup %1623  ;;  %v624_v53 = vmul.f32 %v1861_v49, %v1847_v31  ;;  %vm629_vm2 = vweird.f32 %v1861_v49  ;;  %vm658_vm7 = vweird.f32 %v1857_v45 }
  0xc9   :  { %v1626_v56 = vpop.eup %1625  ;;  %v639_v57 = vmul.f32 %v1866_v52, %v1850_v33  ;;  %1631 = vrcp.f32 %v1863_v50  ;;  %vm644_vm3 = vweird.f32 %v1866_v52  ;;  %v679_v16 = vand.u32 2147483648, %v1863_v50  ;;  %vm1916_vm6 = vmor %vm628_vm0, %vm629_vm2 }
  0xca   :  { %v1628_v59 = vpop.eup %1627  ;;  %v625_v60 = vsub.f32 1.0, %v624_v53  ;;  %1633 = vpow2.f32 %v1375_v51  ;;  %v1876_v0 = vadd.f32 1.0, %v1626_v56  ;;  %vm1926_vm8 = vmor %vm643_vm1, %vm644_vm3  ;;  %v665_v31 = vor.u32 1.1754944e-38, %v664_v15 }
  0xcb   :  { %v640_v63 = vsub.f32 1.0, %v639_v57  ;;  %v1878_v1 = vadd.f32 1.0, %v1628_v59  ;;  %1635 = vpow2.f32 %v1376_v58  ;;  %vm673_vm9 = vweird.f32 %v1863_v50 }
  0xcc   :  { %v626_v2 = vmul.f32 %v1861_v49, %v625_v60  ;;  %1637 = vrcp.f32 %v1876_v0  ;;  %v677_v38 = vand.u32 2147483647, %v1863_v50  ;;  %v692_v40 = vand.u32 2147483647, %v1876_v0 }
  0xcd   :  { %v641_v4 = vmul.f32 %v1866_v52, %v640_v63  ;;  %v1883_v5 = vpop.eup %1629  ;;  %1639 = vrcp.f32 %v1878_v1  ;;  %vm1941_vm10 = vcmp.eq.f32.partialorder %v662_v14, 8.507059e+37  ;;  %v1945_v47 = vor.u32 1.1754944e-38, %v679_v16 }
  0xce   :  { %v654_v41 = vmul.f32 %v1883_v5, %v1857_v45  ;;  %v627_v18 = vadd.f32 %v1861_v49, %v626_v2  ;;  %vm659_vm11 = vweird.f32 %v1883_v5  ;;  %vm688_vm12 = vweird.f32 %v1876_v0 }
  0xcf   :  { %v1894_v13 = vpop.eup %1631  ;;  %v642_v20 = vadd.f32 %v1866_v52, %v641_v4  ;;  %vm1960_vm13 = vcmp.eq.f32.partialorder %v692_v40, 8.507059e+37  ;;  %v694_v61 = vand.u32 2147483648, %v1876_v0  ;;  %vm1967_vm14 = vmor %vm658_vm7, %vm659_vm11  ;;  %vm1971_vm15 = vcmp.eq.f32.partialorder %v677_v38, 8.507059e+37 }
  0xd0   :  { %v1634_v17 = vpop.eup %1633  ;;  %v655_v21 = vsub.f32 1.0, %v654_v41  ;;  %v669_v22 = vmul.f32 %v1894_v13, %v1863_v50  ;;  %v631_v43 = vsel %vm1916_vm6, %v1861_v49, %v627_v18  ;;  %v707_v4 = vand.u32 2147483647, %v1878_v1 }
  0xd1   :  { %v1636_v29 = vpop.eup %1635  ;;  %v1933_v42 = vadd.f32 1.0, %v1634_v17  ;;  %v646_v33 = vsel %vm1926_vm8, %v1866_v52, %v642_v20  ;;  %v636_v58 = vsel %vm1904_vm4, %v635_v26, %v631_v43  ;;  %vm674_vm1 = vweird.f32 %v1894_v13 }
  0xd2   :  { %v656_v34 = vmul.f32 %v1883_v5, %v655_v21  ;;  %v670_v35 = vsub.f32 1.0, %v669_v22  ;;  %v1638_v36 = vpop.eup %1637  ;;  %v1951_v49 = vadd.f32 1.0, %v1636_v29  ;;  %v651_v59 = vsel %vm1908_vm5, %v650_v32, %v646_v33  ;;  %vm1990_vm5 = vmor %vm673_vm9, %vm674_vm1 }
  0xd3   :  { %v684_v48 = vmul.f32 %v1638_v36, %v1876_v0  ;;  %v544_v51 = vpop.f32.mrf.mxu0  ;;  %v1640_v53 = vpop.eup %1639  ;;  %1641 = vrcp.f32 %v1933_v42  ;;  %vm689_vm0 = vweird.f32 %v1638_v36  ;;  %v709_v45 = vand.u32 2147483648, %v1878_v1 }
  0xd4   :  { %v657_v54 = vadd.f32 %v1883_v5, %v656_v34  ;;  %v558_v55 = vpop.f32.mrf.mxu1  ;;  %v671_v52 = vmul.f32 %v1894_v13, %v670_v35  ;;  %v699_v57 = vmul.f32 %v1640_v53, %v1878_v1  ;;  %1643 = vrcp.f32 %v1951_v49  ;;  %vm690_vm3 = vmor %vm688_vm12, %vm689_vm0 }
  0xd5   :  { %v685_v56 = vsub.f32 1.0, %v684_v48  ;;  %vm704_vm2 = vweird.f32 %v1640_v53  ;;  %v743_v41 = vmul.f32 %v636_v58, %v1831_v10  ;;  %v744_v14 = vmul.f32 %v651_v59, %v1834_v12 }
  0xd6   :  { %v700_v3 = vsub.f32 1.0, %v699_v57  ;;  %v661_v6 = vsel %vm1967_vm14, %v1883_v5, %v657_v54  ;;  %v672_v7 = vadd.f32 %v1894_v13, %v671_v52  ;;  %v695_v5 = vor.u32 1.1754944e-38, %v694_v61 }
  0xd7   :  { %v686_v2 = vmul.f32 %v1638_v36, %v685_v56  ;;  %vm703_vm4 = vweird.f32 %v1878_v1  ;;  %vm708_vm6 = vcmp.eq.f32.partialorder %v707_v4, 8.507059e+37  ;;  %v666_v12 = vsel %vm1941_vm10, %v665_v31, %v661_v6 }
  0xd8   :  { %v701_v9 = vmul.f32 %v1640_v53, %v700_v3  ;;  %vm705_vm7 = vmor %vm703_vm4, %vm704_vm2  ;;  %v710_v1 = vor.u32 1.1754944e-38, %v709_v45  ;;  %v722_v50 = vand.u32 2147483647, %v1933_v42  ;;  %v676_v20 = vsel %vm1990_vm5, %v1894_v13, %v672_v7 }
  0xd9   :  { %v687_v8 = vadd.f32 %v1638_v36, %v686_v2  ;;  %v1642_v11 = vpop.eup %1641  ;;  %vm718_vm8 = vweird.f32 %v1933_v42  ;;  %v724_v30 = vand.u32 2147483648, %v1933_v42  ;;  %v751_v32 = vmul.f32 %v743_v41, %v544_v51 }
  0xda   :  { %v702_v18 = vadd.f32 %v1640_v53, %v701_v9  ;;  %v714_v10 = vmul.f32 %v1642_v11, %v1933_v42  ;;  %v1644_v28 = vpop.eup %1643  ;;  %vm719_vm9 = vweird.f32 %v1642_v11  ;;  %v681_v31 = vsel %vm1971_vm15, %v1945_v47, %v676_v20 }
  0xdb   :  { %v572_v15 = vpop.f32.mrf.mxu2  ;;  %v691_v17 = vsel %vm690_vm3, %v1638_v36, %v687_v8  ;;  %v546_v26 = vpop.f32.mrf.mxu0  ;;  %v729_v13 = vmul.f32 %v1644_v28, %v1951_v49  ;;  %vm723_vm10 = vcmp.eq.f32.partialorder %v722_v50, 8.507059e+37  ;;  %v752_v33 = vmul.f32 %v744_v14, %v558_v55  ;;  %vm720_vm11 = vmor %vm718_vm8, %vm719_vm9 }
  0xdc   :  { %v696_v0 = vsel %vm1960_vm13, %v695_v5, %v691_v17  ;;  %v706_v22 = vsel %vm705_vm7, %v1640_v53, %v702_v18  ;;  %v715_v25 = vsub.f32 1.0, %v714_v10  ;;  %v586_v34 = vpop.f32.mrf.mxu3  ;;  %v560_v35 = vpop.f32.mrf.mxu1  ;;  %v737_v48 = vand.u32 2147483647, %v1951_v49 }
  0xdd   :  { %v747_v21 = vmul.f32 %v696_v0, %v1842_v24  ;;  %v711_v29 = vsel %vm708_vm6, %v710_v1, %v706_v22  ;;  %v745_v24 = vmul.f32 %v666_v12, %v1837_v19  ;;  %v730_v43 = vsub.f32 1.0, %v729_v13 }
  0xde   :  { %v748_v36 = vmul.f32 %v711_v29, %v1845_v27  ;;  %v716_v37 = vmul.f32 %v1642_v11, %v715_v25  ;;  %v725_v27 = vor.u32 1.1754944e-38, %v724_v30  ;;  %v739_v51 = vand.u32 2147483648, %v1951_v49 }
  0xdf   :  { %v755_v38 = vmul.f32 %v747_v21, %v546_v26  ;;  %v731_v54 = vmul.f32 %v1644_v28, %v730_v43  ;;  %vm734_vm12 = vweird.f32 %v1644_v28  ;;  %vm733_vm13 = vweird.f32 %v1951_v49 }
  0xe0   :  { %v717_v40 = vadd.f32 %v1642_v11, %v716_v37  ;;  %v756_v44 = vmul.f32 %v748_v36, %v560_v35  ;;  %v746_v42 = vmul.f32 %v681_v31, %v1840_v23  ;;  %vm735_vm14 = vmor %vm733_vm13, %vm734_vm12  ;;  %v740_v58 = vor.u32 1.1754944e-38, %v739_v51 }
  0xe1   :  { %v761_v53 = vpack.c.bf16 %v755_v38, %v751_v32  ;;  %v732_v55 = vadd.f32 %v1644_v28, %v731_v54  ;;  %vm738_vm15 = vcmp.eq.f32.partialorder %v737_v48, 8.507059e+37  ;;  %v753_v60 = vmul.f32 %v745_v24, %v572_v15 }
  0xe2   :  { %v721_v19 = vsel %vm720_vm11, %v1642_v11, %v717_v40  ;;  %v762_v52 = vpack.c.bf16 %v756_v44, %v752_v33  ;;  %v754_v4 = vmul.f32 %v746_v42, %v586_v34 }
  0xe3   :  { %v726_v47 = vsel %vm723_vm10, %v725_v27, %v721_v19  ;;  %v574_v56 = vpop.f32.mrf.mxu2  ;;  %1029 = vmatmul.bf16.vlgmr.msra.gmra.mxu0 %v761_v53  ;;  %v736_v59 = vsel %vm735_vm14, %v1644_v28, %v732_v55 }
  0xe4   :  { %v749_v57 = vmul.f32 %v726_v47, %v1855_v39  ;;  %1043 = vmatmul.bf16.vlgmr.msra.gmra.mxu1 %v762_v52  ;;  %v741_v62 = vsel %vm738_vm15, %v740_v58, %v736_v59  ;;  %v588_v63 = vpop.f32.mrf.mxu3 }
  0xe5   :  { %v750_v2 = vmul.f32 %v741_v62, %v1859_v46 }
  0xe6   :  { %v757_v61 = vmul.f32 %v749_v57, %v574_v56 }
  0xe7   :  { %v758_v6 = vmul.f32 %v750_v2, %v588_v63 }
  0xe8   :  { %v763_v3 = vpack.c.bf16 %v757_v61, %v753_v60 }
  0xe9   :  { %v764_v39 = vpack.c.bf16 %v758_v6, %v754_v4 }
  0xea   :  { %1057 = vmatmul.bf16.vlgmr.msra.gmra.mxu2 %v763_v3 }
  0xeb   :  { %1071 = vmatmul.bf16.vlgmr.msra.gmra.mxu3 %v764_v39 }
 0x160   :  { %v1030_v49 = vpop.f32.mrf.mxu0 }
 0x161   :  { %v1044_v45 = vpop.f32.mrf.mxu1 }
 0x162   :  { %v1045_v7 = vadd.f32 %v1044_v45, %v1030_v49 }
 0x168   :  { %v1032_v9 = vpop.f32.mrf.mxu0 }
 0x169   :  { %v1046_v11 = vpop.f32.mrf.mxu1 }
 0x16a   :  { %v1047_v5 = vadd.f32 %v1046_v11, %v1032_v9 }
 0x16d   :  { %v1058_v23 = vpop.f32.mrf.mxu2 }
 0x16e   :  { %v1059_v8 = vadd.f32 %v1058_v23, %v1045_v7  ;;  %v1072_v41 = vpop.f32.mrf.mxu3 }
 0x170   :  { %v1073_v14 = vadd.f32 %v1072_v41, %v1059_v8 }
 0x172   :  { %1086 = vst [vmem:[#allocation11] sm:$0xff] %v1073_v14 }
 0x175   :  { %v1060_v15 = vpop.f32.mrf.mxu2 }
 0x176   :  { %v1061_v16 = vadd.f32 %v1060_v15, %v1047_v5  ;;  %v1074_v46 = vpop.f32.mrf.mxu3 }
 0x178   :  { %v1075_v17 = vadd.f32 %v1074_v46, %v1061_v16 }
 0x17a   :  { %1087 = vst [vmem:[#allocation11 + $0x8] sm:$0xff] %v1075_v17 }
 0x17b   :  { %1100 = dma.vmem_to_hbm [thread:$0]  %s1093_s3, 256, %s1095_s13, [#allocation5], %s1782_s14, %s1782_s14, %s1783_s15  }
 0x17c   :  { %1771 = dma.done.wait [#allocation5], 256  }
 0x17d   :  { %1772 = vsyncadd [#allocation5], 4294967040 }
 0x17e   :  { %1105 = vsyncpa [#allocation4], 1 }
 0x17f   :  { %1106 = vsyncpa [#allocation7], 1 }
 0x180   :  { %1107 = vsyncpa [#allocation10], 1 }
 0x181   :  { %1108 = vsyncpa [#allocation5], 1 }

</bundles_post_ra>
